<compile_context>
chip_gen: v5e
topology: v5e:2x2
jax: 0.10.0
libtpu: 0.0.40
codegen_flags: <defaults>
</compile_context>

<pallas_src>
import jax
import jax.numpy as jnp
import numpy as np
from jax import lax
from jax.experimental import pallas as pl
from jax.experimental.pallas import tpu as pltpu

# ---- synthetic stand-ins for `constants` --------------------------------
MAX_DATASETS = 4
MAX_SUBJECTS_PER_DATASET = 8
NUM_SUBJECT_EMBEDDINGS = MAX_DATASETS * MAX_SUBJECTS_PER_DATASET


# --------------------------- Pallas kernel -------------------------------
def _backbone_kernel(ds_ref,                                   # scalar prefetch (SMEM)
                     x_ref, w1f_ref, b1i_ref, b1l_ref, b1r_ref,
                     w2s_ref, b2_ref,
                     out_ref):
    """One block of Bb batch elements per grid step.

    x_ref   : (Bb, C_in, T)          input block
    w1f_ref : (D, M, K*C_in)         conv1 with projection folded in, taps stacked
    b1i_ref : (D, M, 1)              conv1 fused bias (interior columns)
    b1l_ref : (D, M, 1)              bias correction at t = 0
    b1r_ref : (D, M, 1)              bias correction at t = T-1
    w2s_ref : (M, K*M)               conv2 weight, taps stacked
    b2_ref  : (M, 1)                 conv2 bias
    out_ref : (Bb, M)                mean-pooled features
    """
    bb, _, t = x_ref.shape
    base = pl.program_id(0) * bb

    # hoisted: column masks + shared conv2 weights/bias (dataset independent)
    col = lax.broadcasted_iota(jnp.int32, (1, t), 1)
    is_first = col == 0
    is_last = col == (t - 1)
    w2s = w2s_ref[...]
    b2 = b2_ref[...]

    def elu(v):
        return jnp.where(v > 0, v, jnp.exp(v) - 1.0)

    def shift_stack(v):
        # rows: [v(t-1) ; v(t) ; v(t+1)] with zeroed boundary columns,
        # i.e. exactly a zero-padded kernel-3 "same" conv when contracted
        # against the tap-stacked weight.  pltpu.roll = cheap XLU rotate.
        prev = jnp.where(is_first, 0.0, pltpu.roll(v, 1, 1))
        nxt = jnp.where(is_last, 0.0, pltpu.roll(v, t - 1, 1))
        return jnp.concatenate([prev, v, nxt], axis=0)

    for i in range(bb):                      # static unroll over the batch block
        d = ds_ref[base + i]                 # per-row dataset id (SMEM scalar)
        x = x_ref[i]                         # (C_in, T)

        # --- stage 1: fused (projection + conv1) + ELU, single MXU matmul ---
        bias1 = (b1i_ref[d]
                 + jnp.where(is_first, b1l_ref[d], 0.0)
                 + jnp.where(is_last, b1r_ref[d], 0.0))          # (M, T)
        h = elu(jnp.dot(w1f_ref[d], shift_stack(x),
                        preferred_element_type=jnp.float32) + bias1)

        # --- stage 2: conv2 + ELU, single MXU matmul (K = 3*M contraction) ---
        h = elu(jnp.dot(w2s, shift_stack(h),
                        preferred_element_type=jnp.float32) + b2)

        # --- temporal mean pooling ---
        out_ref[pl.ds(i, 1), :] = jnp.mean(h, axis=-1)[None, :]


# ------------------------------ wrapper ----------------------------------
def backbone_features(params, x, dataset_id, *, block_b=8):
    """Pooled encoder features. x: (B, C_in, T) f32; dataset_id: (B,) int."""
    B, c_in, T = x.shape
    D, M, _ = params["proj_w"].shape
    K = params["conv1_w"].shape[0]

    pw, pb = params["proj_w"], params["proj_b"]
    c1, c1b = params["conv1_w"], params["conv1_b"]
    c2, c2b = params["conv2_w"], params["conv2_b"]

    # Fold dataset-gated projection into conv1; stack taps along contraction.
    w1f = jnp.einsum("kom,dmc->dokc", c1, pw).reshape(D, M, K * c_in)
    b1i = jnp.einsum("om,dmx->dox", jnp.sum(c1, axis=0), pb) + c1b[None]
    b1l = -jnp.einsum("om,dmx->dox", c1[0], pb)       # missing left tap at t=0
    b1r = -jnp.einsum("om,dmx->dox", c1[K - 1], pb)   # missing right tap at t=T-1
    w2s = jnp.transpose(c2, (1, 0, 2)).reshape(M, K * M)

    bb = int(min(block_b, B))
    b_pad = -(-B // bb) * bb
    if b_pad != B:
        x = jnp.pad(x, ((0, b_pad - B), (0, 0), (0, 0)))
        dataset_id = jnp.pad(dataset_id, (0, b_pad - B))

    grid_spec = pltpu.PrefetchScalarGridSpec(
        num_scalar_prefetch=1,
        grid=(b_pad // bb,),
        in_specs=[
            pl.BlockSpec((bb, c_in, T), lambda b, ds: (b, 0, 0)),       # x block
            pl.BlockSpec((D, M, K * c_in), lambda b, ds: (0, 0, 0)),    # fused conv1 W (all datasets, resident)
            pl.BlockSpec((D, M, 1), lambda b, ds: (0, 0, 0)),           # fused bias (interior)
            pl.BlockSpec((D, M, 1), lambda b, ds: (0, 0, 0)),           # bias corr t=0
            pl.BlockSpec((D, M, 1), lambda b, ds: (0, 0, 0)),           # bias corr t=T-1
            pl.BlockSpec((M, K * M), lambda b, ds: (0, 0)),             # stacked conv2 W
            pl.BlockSpec((M, 1), lambda b, ds: (0, 0)),                 # conv2 bias
        ],
        out_specs=pl.BlockSpec((bb, M), lambda b, ds: (b, 0)),
    )

    feats = pl.pallas_call(
        _backbone_kernel,
        out_shape=jax.ShapeDtypeStruct((b_pad, M), jnp.float32),
        grid_spec=grid_spec,
        compiler_params=pltpu.CompilerParams(
            dimension_semantics=("parallel",)),
    )(dataset_id.astype(jnp.int32), x.astype(jnp.float32),
      w1f, b1i, b1l, b1r, w2s, c2b)
    return feats[:B]


def backbone_forward(params, x, dataset_id, subject_id):
    feat = backbone_features(params, x, dataset_id)
    z = params["emb"][subject_id.astype(jnp.int32)]      # gather + concat in plain JAX
    return jnp.concatenate([feat, z], axis=1)


class Backbone:
    """Thin Python wrapper mirroring the nn.Module interface / bookkeeping."""

    def __init__(self, input_dim, model_dim, subject_embedding_dim,
                 kernel_size=3, key=jax.random.PRNGKey(0)):
        ks = jax.random.split(key, 7)
        s_proj = 1.0 / np.sqrt(input_dim)
        s_conv = 1.0 / np.sqrt(model_dim * kernel_size)
        self.model_dim = model_dim
        self.params = dict(
            proj_w=jax.random.normal(ks[0], (MAX_DATASETS, model_dim, input_dim),
                                     jnp.float32) * s_proj,
            proj_b=jax.random.normal(ks[1], (MAX_DATASETS, model_dim, 1),
                                     jnp.float32) * 0.01,
            conv1_w=jax.random.normal(ks[2], (kernel_size, model_dim, model_dim),
                                      jnp.float32) * s_conv,
            conv1_b=jax.random.normal(ks[3], (model_dim, 1), jnp.float32) * 0.01,
            conv2_w=jax.random.normal(ks[4], (kernel_size, model_dim, model_dim),
                                      jnp.float32) * s_conv,
            conv2_b=jax.random.normal(ks[5], (model_dim, 1), jnp.float32) * 0.01,
            emb=jax.random.normal(ks[6], (NUM_SUBJECT_EMBEDDINGS,
                                          subject_embedding_dim), jnp.float32),
        )
        self.trained_subjects = set()

    def __call__(self, x, dataset_id, subject_id, use_mean_subject_embedding=False):
        feat = backbone_features(self.params, x, dataset_id)
        if not use_mean_subject_embedding:
            z = self.params["emb"][subject_id.astype(jnp.int32)]
            self.trained_subjects |= set(int(s) for s in np.asarray(subject_id).tolist())
            return jnp.concatenate([feat, z], axis=1)
        # TODO(synk): mean-subject-embedding branch relies on stateful Python
        # set bookkeeping (not jit/trace safe); tiny mean/concat done in plain JAX.
        idx = jnp.array(sorted(self.trained_subjects), dtype=jnp.int32)
        avg = jnp.mean(self.params["emb"][idx], axis=0, keepdims=True)
        avg = jnp.broadcast_to(avg, (feat.shape[0], avg.shape[1]))
        return jnp.concatenate([feat, avg], axis=1)


# ------------------------- pure-JAX reference ----------------------------
def backbone_ref(params, x, dataset_id, subject_id):
    def elu(v):
        return jnp.where(v > 0, v, jnp.exp(v) - 1.0)

    def conv(h, w, b):
        T = h.shape[-1]
        hp = jnp.pad(h, ((0, 0), (0, 0), (1, 1)))
        acc = sum(jnp.einsum("om,bmt->bot", w[k], hp[..., k:k + T])
                  for k in range(w.shape[0]))
        return acc + b[None]

    pw = params["proj_w"][dataset_id]
    pb = params["proj_b"][dataset_id]
    h = jnp.einsum("bmc,bct->bmt", pw, x) + pb
    h = elu(conv(h, params["conv1_w"], params["conv1_b"]))
    h = elu(conv(h, params["conv2_w"], params["conv2_b"]))
    feat = jnp.mean(h, axis=-1)
    z = params["emb"][subject_id]
    return jnp.concatenate([feat, z], axis=1)


# --------------------------------- main ----------------------------------
if __name__ == "__main__":
    input_dim, model_dim, subject_embedding_dim = 8, 32, 16
    B, T = 2, 128

    root = jax.random.PRNGKey(0)
    k_param, k_x = jax.random.split(root, 2)

    model = Backbone(input_dim, model_dim, subject_embedding_dim, key=k_param)

    x = jax.random.normal(k_x, (B, input_dim, T), jnp.float32)
    dataset_id = jnp.array([0, 2], dtype=jnp.int32)
    subject_id = jnp.array([3, 17], dtype=jnp.int32)

    out = model(x, dataset_id, subject_id, use_mean_subject_embedding=False)
    out = jax.block_until_ready(out)

    assert out.shape == (B, model_dim + subject_embedding_dim)
    ref = backbone_ref(model.params, x, dataset_id, subject_id)
    np.testing.assert_allclose(np.asarray(out), np.asarray(ref),
                               rtol=2e-2, atol=2e-2)

    print("KERNEL_OK")
</pallas_src>

<mosaic_0001>
module attributes {stable_mosaic.version = 11 : i64} {
  func.func @_backbone_kernel(%arg0: i32, %arg1: memref<2xi32, #tpu.memory_space<smem>>, %arg2: memref<2x8x128xf32, #tpu.memory_space<vmem>>, %arg3: memref<4x32x24xf32, #tpu.memory_space<vmem>>, %arg4: memref<4x32x1xf32, #tpu.memory_space<vmem>>, %arg5: memref<4x32x1xf32, #tpu.memory_space<vmem>>, %arg6: memref<4x32x1xf32, #tpu.memory_space<vmem>>, %arg7: memref<32x96xf32, #tpu.memory_space<vmem>>, %arg8: memref<32x1xf32, #tpu.memory_space<vmem>>, %arg9: memref<2x32xf32, #tpu.memory_space<vmem>>) attributes {dimension_semantics = [#tpu.dimension_semantics<parallel>], iteration_bounds = array<i64: 1>, scalar_prefetch = 1 : i64, scratch_operands = 0 : i64, tpu.core_type = #tpu.core_type<tc>, window_params = [{transform_indices = @transform_0, window_bounds = array<i64: 2, 8, 128>}, {pipeline_mode = #tpu.pipeline_mode<synchronous>, transform_indices = @transform_1, window_bounds = array<i64: 4, 32, 24>}, {pipeline_mode = #tpu.pipeline_mode<synchronous>, transform_indices = @transform_2, window_bounds = array<i64: 4, 32, 1>}, {pipeline_mode = #tpu.pipeline_mode<synchronous>, transform_indices = @transform_3, window_bounds = array<i64: 4, 32, 1>}, {pipeline_mode = #tpu.pipeline_mode<synchronous>, transform_indices = @transform_4, window_bounds = array<i64: 4, 32, 1>}, {pipeline_mode = #tpu.pipeline_mode<synchronous>, transform_indices = @transform_5, window_bounds = array<i64: 32, 96>}, {pipeline_mode = #tpu.pipeline_mode<synchronous>, transform_indices = @transform_6, window_bounds = array<i64: 32, 1>}, {transform_indices = @transform_7, window_bounds = array<i64: 2, 32>}]} {
    %c2_i32 = arith.constant 2 : i32
    %0 = arith.muli %arg0, %c2_i32 : i32
    %1 = tpu.iota {dimensions = array<i32: 1>} : vector<1x128xi32>
    %c0_i32 = arith.constant 0 : i32
    %2 = vector.broadcast %c0_i32 : i32 to vector<1x128xi32>
    %3 = arith.cmpi eq, %1, %2 : vector<1x128xi32>
    %c127_i32 = arith.constant 127 : i32
    %4 = vector.broadcast %c127_i32 : i32 to vector<1x128xi32>
    %5 = arith.cmpi eq, %1, %4 : vector<1x128xi32>
    %c0 = arith.constant 0 : index
    %c0_0 = arith.constant 0 : index
    %6 = vector.load %arg7[%c0, %c0_0] : memref<32x96xf32, #tpu.memory_space<vmem>>, vector<32x96xf32>
    %c0_1 = arith.constant 0 : index
    %c0_2 = arith.constant 0 : index
    %7 = vector.load %arg8[%c0_1, %c0_2] : memref<32x1xf32, #tpu.memory_space<vmem>>, vector<32x1xf32>
    %c0_i32_3 = arith.constant 0 : i32
    %8 = arith.addi %0, %c0_i32_3 : i32
    %9 = arith.index_cast %8 : i32 to index
    %10 = memref.load %arg1[%9] : memref<2xi32, #tpu.memory_space<smem>>
    %c0_4 = arith.constant 0 : index
    %c0_5 = arith.constant 0 : index
    %c0_6 = arith.constant 0 : index
    %11 = vector.load %arg2[%c0_4, %c0_5, %c0_6] : memref<2x8x128xf32, #tpu.memory_space<vmem>>, vector<1x8x128xf32>
    %12 = vector.shape_cast %11 : vector<1x8x128xf32> to vector<8x128xf32>
    %13 = arith.index_cast %10 : i32 to index
    %c0_7 = arith.constant 0 : index
    %c0_8 = arith.constant 0 : index
    %14 = vector.load %arg4[%13, %c0_7, %c0_8] : memref<4x32x1xf32, #tpu.memory_space<vmem>>, vector<1x32x1xf32>
    %15 = vector.shape_cast %14 : vector<1x32x1xf32> to vector<32x1xf32>
    %16 = arith.index_cast %10 : i32 to index
    %c0_9 = arith.constant 0 : index
    %c0_10 = arith.constant 0 : index
    %17 = vector.load %arg5[%16, %c0_9, %c0_10] : memref<4x32x1xf32, #tpu.memory_space<vmem>>, vector<1x32x1xf32>
    %18 = vector.shape_cast %17 : vector<1x32x1xf32> to vector<32x1xf32>
    %cst = arith.constant 0.000000e+00 : f32
    %19 = vector.shape_cast %3 : vector<1x128xi1> to vector<1x128xi1>
    %20 = vector.broadcast %19 : vector<1x128xi1> to vector<32x128xi1>
    %21 = vector.shape_cast %18 : vector<32x1xf32> to vector<32x1xf32>
    %22 = vector.broadcast %21 : vector<32x1xf32> to vector<32x128xf32>
    %23 = vector.broadcast %cst : f32 to vector<32x128xf32>
    %24 = arith.select %20, %22, %23 : vector<32x128xi1>, vector<32x128xf32>
    %25 = vector.broadcast %15 : vector<32x1xf32> to vector<32x128xf32>
    %26 = arith.addf %25, %24 : vector<32x128xf32>
    %27 = arith.index_cast %10 : i32 to index
    %c0_11 = arith.constant 0 : index
    %c0_12 = arith.constant 0 : index
    %28 = vector.load %arg6[%27, %c0_11, %c0_12] : memref<4x32x1xf32, #tpu.memory_space<vmem>>, vector<1x32x1xf32>
    %29 = vector.shape_cast %28 : vector<1x32x1xf32> to vector<32x1xf32>
    %cst_13 = arith.constant 0.000000e+00 : f32
    %30 = vector.shape_cast %5 : vector<1x128xi1> to vector<1x128xi1>
    %31 = vector.broadcast %30 : vector<1x128xi1> to vector<32x128xi1>
    %32 = vector.shape_cast %29 : vector<32x1xf32> to vector<32x1xf32>
    %33 = vector.broadcast %32 : vector<32x1xf32> to vector<32x128xf32>
    %34 = vector.broadcast %cst_13 : f32 to vector<32x128xf32>
    %35 = arith.select %31, %33, %34 : vector<32x128xi1>, vector<32x128xf32>
    %36 = arith.addf %26, %35 : vector<32x128xf32>
    %37 = arith.index_cast %10 : i32 to index
    %c0_14 = arith.constant 0 : index
    %c0_15 = arith.constant 0 : index
    %38 = vector.load %arg3[%37, %c0_14, %c0_15] : memref<4x32x24xf32, #tpu.memory_space<vmem>>, vector<1x32x24xf32>
    %39 = vector.shape_cast %38 : vector<1x32x24xf32> to vector<32x24xf32>
    %c1_i32 = arith.constant 1 : i32
    %40 = tpu.dynamic_rotate %12 by %c1_i32 dim 1 : vector<8x128xf32>, i32 -> vector<8x128xf32>
    %cst_16 = arith.constant 0.000000e+00 : f32
    %41 = vector.shape_cast %3 : vector<1x128xi1> to vector<1x128xi1>
    %42 = vector.broadcast %41 : vector<1x128xi1> to vector<8x128xi1>
    %43 = vector.broadcast %cst_16 : f32 to vector<8x128xf32>
    %44 = arith.select %42, %43, %40 : vector<8x128xi1>, vector<8x128xf32>
    %c127_i32_17 = arith.constant 127 : i32
    %45 = tpu.dynamic_rotate %12 by %c127_i32_17 dim 1 : vector<8x128xf32>, i32 -> vector<8x128xf32>
    %cst_18 = arith.constant 0.000000e+00 : f32
    %46 = vector.shape_cast %5 : vector<1x128xi1> to vector<1x128xi1>
    %47 = vector.broadcast %46 : vector<1x128xi1> to vector<8x128xi1>
    %48 = vector.broadcast %cst_18 : f32 to vector<8x128xf32>
    %49 = arith.select %47, %48, %45 : vector<8x128xi1>, vector<8x128xf32>
    %50 = tpu.concatenate %44, %12, %49 in 0 : vector<8x128xf32>, vector<8x128xf32>, vector<8x128xf32> -> vector<24x128xf32>
    %cst_19 = arith.constant dense<0.000000e+00> : vector<32x128xf32>
    %51 = tpu.matmul %39, %50, %cst_19 {dimension_numbers = #tpu.dot_dimension_numbers<[1], [0], [0], [1], [0, 0, 1, 1], [], []>} : vector<32x24xf32>, vector<24x128xf32>, vector<32x128xf32> -> vector<32x128xf32>
    %52 = arith.addf %51, %36 : vector<32x128xf32>
    %cst_20 = arith.constant 0.000000e+00 : f32
    %53 = vector.broadcast %cst_20 : f32 to vector<32x128xf32>
    %54 = arith.cmpf ogt, %52, %53 : vector<32x128xf32>
    %55 = math.exp %52 : vector<32x128xf32>
    %cst_21 = arith.constant 1.000000e+00 : f32
    %56 = vector.broadcast %cst_21 : f32 to vector<32x128xf32>
    %57 = arith.subf %55, %56 : vector<32x128xf32>
    %58 = arith.select %54, %52, %57 : vector<32x128xi1>, vector<32x128xf32>
    %c1_i32_22 = arith.constant 1 : i32
    %59 = tpu.dynamic_rotate %58 by %c1_i32_22 dim 1 : vector<32x128xf32>, i32 -> vector<32x128xf32>
    %cst_23 = arith.constant 0.000000e+00 : f32
    %60 = vector.shape_cast %3 : vector<1x128xi1> to vector<1x128xi1>
    %61 = vector.broadcast %60 : vector<1x128xi1> to vector<32x128xi1>
    %62 = vector.broadcast %cst_23 : f32 to vector<32x128xf32>
    %63 = arith.select %61, %62, %59 : vector<32x128xi1>, vector<32x128xf32>
    %c127_i32_24 = arith.constant 127 : i32
    %64 = tpu.dynamic_rotate %58 by %c127_i32_24 dim 1 : vector<32x128xf32>, i32 -> vector<32x128xf32>
    %cst_25 = arith.constant 0.000000e+00 : f32
    %65 = vector.shape_cast %5 : vector<1x128xi1> to vector<1x128xi1>
    %66 = vector.broadcast %65 : vector<1x128xi1> to vector<32x128xi1>
    %67 = vector.broadcast %cst_25 : f32 to vector<32x128xf32>
    %68 = arith.select %66, %67, %64 : vector<32x128xi1>, vector<32x128xf32>
    %69 = tpu.concatenate %63, %58, %68 in 0 : vector<32x128xf32>, vector<32x128xf32>, vector<32x128xf32> -> vector<96x128xf32>
    %cst_26 = arith.constant dense<0.000000e+00> : vector<32x128xf32>
    %70 = tpu.matmul %6, %69, %cst_26 {dimension_numbers = #tpu.dot_dimension_numbers<[1], [0], [0], [1], [0, 0, 1, 1], [], []>} : vector<32x96xf32>, vector<96x128xf32>, vector<32x128xf32> -> vector<32x128xf32>
    %71 = vector.broadcast %7 : vector<32x1xf32> to vector<32x128xf32>
    %72 = arith.addf %70, %71 : vector<32x128xf32>
    %cst_27 = arith.constant 0.000000e+00 : f32
    %73 = vector.broadcast %cst_27 : f32 to vector<32x128xf32>
    %74 = arith.cmpf ogt, %72, %73 : vector<32x128xf32>
    %75 = math.exp %72 : vector<32x128xf32>
    %cst_28 = arith.constant 1.000000e+00 : f32
    %76 = vector.broadcast %cst_28 : f32 to vector<32x128xf32>
    %77 = arith.subf %75, %76 : vector<32x128xf32>
    %78 = arith.select %74, %72, %77 : vector<32x128xi1>, vector<32x128xf32>
    %cst_29 = arith.constant dense<0.000000e+00> : vector<32xf32>
    %79 = vector.multi_reduction <add>, %78, %cst_29 [1] : vector<32x128xf32> to vector<32xf32>
    %cst_30 = arith.constant 1.280000e+02 : f32
    %80 = vector.broadcast %cst_30 : f32 to vector<32xf32>
    %81 = arith.divf %79, %80 : vector<32xf32>
    %82 = vector.shape_cast %81 : vector<32xf32> to vector<1x32xf32>
    %c0_31 = arith.constant 0 : index
    %c0_32 = arith.constant 0 : index
    %83 = vector.load %arg9[%c0_31, %c0_32] : memref<2x32xf32, #tpu.memory_space<vmem>>, vector<1x32xf32>
    tpu.vector_store %arg9[%c0_31, %c0_32], %82 {strides = array<i32>} : memref<2x32xf32, #tpu.memory_space<vmem>>, vector<1x32xf32>,
    %c1_i32_33 = arith.constant 1 : i32
    %84 = arith.addi %0, %c1_i32_33 : i32
    %85 = arith.index_cast %84 : i32 to index
    %86 = memref.load %arg1[%85] : memref<2xi32, #tpu.memory_space<smem>>
    %c1 = arith.constant 1 : index
    %c0_34 = arith.constant 0 : index
    %c0_35 = arith.constant 0 : index
    %87 = vector.load %arg2[%c1, %c0_34, %c0_35] : memref<2x8x128xf32, #tpu.memory_space<vmem>>, vector<1x8x128xf32>
    %88 = vector.shape_cast %87 : vector<1x8x128xf32> to vector<8x128xf32>
    %89 = arith.index_cast %86 : i32 to index
    %c0_36 = arith.constant 0 : index
    %c0_37 = arith.constant 0 : index
    %90 = vector.load %arg4[%89, %c0_36, %c0_37] : memref<4x32x1xf32, #tpu.memory_space<vmem>>, vector<1x32x1xf32>
    %91 = vector.shape_cast %90 : vector<1x32x1xf32> to vector<32x1xf32>
    %92 = arith.index_cast %86 : i32 to index
    %c0_38 = arith.constant 0 : index
    %c0_39 = arith.constant 0 : index
    %93 = vector.load %arg5[%92, %c0_38, %c0_39] : memref<4x32x1xf32, #tpu.memory_space<vmem>>, vector<1x32x1xf32>
    %94 = vector.shape_cast %93 : vector<1x32x1xf32> to vector<32x1xf32>
    %cst_40 = arith.constant 0.000000e+00 : f32
    %95 = vector.shape_cast %3 : vector<1x128xi1> to vector<1x128xi1>
    %96 = vector.broadcast %95 : vector<1x128xi1> to vector<32x128xi1>
    %97 = vector.shape_cast %94 : vector<32x1xf32> to vector<32x1xf32>
    %98 = vector.broadcast %97 : vector<32x1xf32> to vector<32x128xf32>
    %99 = vector.broadcast %cst_40 : f32 to vector<32x128xf32>
    %100 = arith.select %96, %98, %99 : vector<32x128xi1>, vector<32x128xf32>
    %101 = vector.broadcast %91 : vector<32x1xf32> to vector<32x128xf32>
    %102 = arith.addf %101, %100 : vector<32x128xf32>
    %103 = arith.index_cast %86 : i32 to index
    %c0_41 = arith.constant 0 : index
    %c0_42 = arith.constant 0 : index
    %104 = vector.load %arg6[%103, %c0_41, %c0_42] : memref<4x32x1xf32, #tpu.memory_space<vmem>>, vector<1x32x1xf32>
    %105 = vector.shape_cast %104 : vector<1x32x1xf32> to vector<32x1xf32>
    %cst_43 = arith.constant 0.000000e+00 : f32
    %106 = vector.shape_cast %5 : vector<1x128xi1> to vector<1x128xi1>
    %107 = vector.broadcast %106 : vector<1x128xi1> to vector<32x128xi1>
    %108 = vector.shape_cast %105 : vector<32x1xf32> to vector<32x1xf32>
    %109 = vector.broadcast %108 : vector<32x1xf32> to vector<32x128xf32>
    %110 = vector.broadcast %cst_43 : f32 to vector<32x128xf32>
    %111 = arith.select %107, %109, %110 : vector<32x128xi1>, vector<32x128xf32>
    %112 = arith.addf %102, %111 : vector<32x128xf32>
    %113 = arith.index_cast %86 : i32 to index
    %c0_44 = arith.constant 0 : index
    %c0_45 = arith.constant 0 : index
    %114 = vector.load %arg3[%113, %c0_44, %c0_45] : memref<4x32x24xf32, #tpu.memory_space<vmem>>, vector<1x32x24xf32>
    %115 = vector.shape_cast %114 : vector<1x32x24xf32> to vector<32x24xf32>
    %c1_i32_46 = arith.constant 1 : i32
    %116 = tpu.dynamic_rotate %88 by %c1_i32_46 dim 1 : vector<8x128xf32>, i32 -> vector<8x128xf32>
    %cst_47 = arith.constant 0.000000e+00 : f32
    %117 = vector.shape_cast %3 : vector<1x128xi1> to vector<1x128xi1>
    %118 = vector.broadcast %117 : vector<1x128xi1> to vector<8x128xi1>
    %119 = vector.broadcast %cst_47 : f32 to vector<8x128xf32>
    %120 = arith.select %118, %119, %116 : vector<8x128xi1>, vector<8x128xf32>
    %c127_i32_48 = arith.constant 127 : i32
    %121 = tpu.dynamic_rotate %88 by %c127_i32_48 dim 1 : vector<8x128xf32>, i32 -> vector<8x128xf32>
    %cst_49 = arith.constant 0.000000e+00 : f32
    %122 = vector.shape_cast %5 : vector<1x128xi1> to vector<1x128xi1>
    %123 = vector.broadcast %122 : vector<1x128xi1> to vector<8x128xi1>
    %124 = vector.broadcast %cst_49 : f32 to vector<8x128xf32>
    %125 = arith.select %123, %124, %121 : vector<8x128xi1>, vector<8x128xf32>
    %126 = tpu.concatenate %120, %88, %125 in 0 : vector<8x128xf32>, vector<8x128xf32>, vector<8x128xf32> -> vector<24x128xf32>
    %cst_50 = arith.constant dense<0.000000e+00> : vector<32x128xf32>
    %127 = tpu.matmul %115, %126, %cst_50 {dimension_numbers = #tpu.dot_dimension_numbers<[1], [0], [0], [1], [0, 0, 1, 1], [], []>} : vector<32x24xf32>, vector<24x128xf32>, vector<32x128xf32> -> vector<32x128xf32>
    %128 = arith.addf %127, %112 : vector<32x128xf32>
    %cst_51 = arith.constant 0.000000e+00 : f32
    %129 = vector.broadcast %cst_51 : f32 to vector<32x128xf32>
    %130 = arith.cmpf ogt, %128, %129 : vector<32x128xf32>
    %131 = math.exp %128 : vector<32x128xf32>
    %cst_52 = arith.constant 1.000000e+00 : f32
    %132 = vector.broadcast %cst_52 : f32 to vector<32x128xf32>
    %133 = arith.subf %131, %132 : vector<32x128xf32>
    %134 = arith.select %130, %128, %133 : vector<32x128xi1>, vector<32x128xf32>
    %c1_i32_53 = arith.constant 1 : i32
    %135 = tpu.dynamic_rotate %134 by %c1_i32_53 dim 1 : vector<32x128xf32>, i32 -> vector<32x128xf32>
    %cst_54 = arith.constant 0.000000e+00 : f32
    %136 = vector.shape_cast %3 : vector<1x128xi1> to vector<1x128xi1>
    %137 = vector.broadcast %136 : vector<1x128xi1> to vector<32x128xi1>
    %138 = vector.broadcast %cst_54 : f32 to vector<32x128xf32>
    %139 = arith.select %137, %138, %135 : vector<32x128xi1>, vector<32x128xf32>
    %c127_i32_55 = arith.constant 127 : i32
    %140 = tpu.dynamic_rotate %134 by %c127_i32_55 dim 1 : vector<32x128xf32>, i32 -> vector<32x128xf32>
    %cst_56 = arith.constant 0.000000e+00 : f32
    %141 = vector.shape_cast %5 : vector<1x128xi1> to vector<1x128xi1>
    %142 = vector.broadcast %141 : vector<1x128xi1> to vector<32x128xi1>
    %143 = vector.broadcast %cst_56 : f32 to vector<32x128xf32>
    %144 = arith.select %142, %143, %140 : vector<32x128xi1>, vector<32x128xf32>
    %145 = tpu.concatenate %139, %134, %144 in 0 : vector<32x128xf32>, vector<32x128xf32>, vector<32x128xf32> -> vector<96x128xf32>
    %cst_57 = arith.constant dense<0.000000e+00> : vector<32x128xf32>
    %146 = tpu.matmul %6, %145, %cst_57 {dimension_numbers = #tpu.dot_dimension_numbers<[1], [0], [0], [1], [0, 0, 1, 1], [], []>} : vector<32x96xf32>, vector<96x128xf32>, vector<32x128xf32> -> vector<32x128xf32>
    %147 = vector.broadcast %7 : vector<32x1xf32> to vector<32x128xf32>
    %148 = arith.addf %146, %147 : vector<32x128xf32>
    %cst_58 = arith.constant 0.000000e+00 : f32
    %149 = vector.broadcast %cst_58 : f32 to vector<32x128xf32>
    %150 = arith.cmpf ogt, %148, %149 : vector<32x128xf32>
    %151 = math.exp %148 : vector<32x128xf32>
    %cst_59 = arith.constant 1.000000e+00 : f32
    %152 = vector.broadcast %cst_59 : f32 to vector<32x128xf32>
    %153 = arith.subf %151, %152 : vector<32x128xf32>
    %154 = arith.select %150, %148, %153 : vector<32x128xi1>, vector<32x128xf32>
    %cst_60 = arith.constant dense<0.000000e+00> : vector<32xf32>
    %155 = vector.multi_reduction <add>, %154, %cst_60 [1] : vector<32x128xf32> to vector<32xf32>
    %cst_61 = arith.constant 1.280000e+02 : f32
    %156 = vector.broadcast %cst_61 : f32 to vector<32xf32>
    %157 = arith.divf %155, %156 : vector<32xf32>
    %158 = vector.shape_cast %157 : vector<32xf32> to vector<1x32xf32>
    %c1_62 = arith.constant 1 : index
    %c0_63 = arith.constant 0 : index
    %159 = vector.load %arg9[%c1_62, %c0_63] : memref<2x32xf32, #tpu.memory_space<vmem>>, vector<1x32xf32>
    tpu.vector_store %arg9[%c1_62, %c0_63], %158 {strides = array<i32>} : memref<2x32xf32, #tpu.memory_space<vmem>>, vector<1x32xf32>,
    return
  }
  func.func @transform_0(%arg0: i32, %arg1: memref<2xi32, #tpu.memory_space<smem>>) -> (i32, i32, i32) {
    %c0_i32 = arith.constant 0 : i32
    %c0_i32_0 = arith.constant 0 : i32
    %c0_i32_1 = arith.constant 0 : i32
    return %arg0, %c0_i32, %c0_i32_0 : i32, i32, i32
  }
  func.func @transform_1(%arg0: i32, %arg1: memref<2xi32, #tpu.memory_space<smem>>) -> (i32, i32, i32) {
    %c0_i32 = arith.constant 0 : i32
    %c0_i32_0 = arith.constant 0 : i32
    %c0_i32_1 = arith.constant 0 : i32
    %c0_i32_2 = arith.constant 0 : i32
    return %c0_i32, %c0_i32_0, %c0_i32_1 : i32, i32, i32
  }
  func.func @transform_2(%arg0: i32, %arg1: memref<2xi32, #tpu.memory_space<smem>>) -> (i32, i32, i32) {
    %c0_i32 = arith.constant 0 : i32
    %c0_i32_0 = arith.constant 0 : i32
    %c0_i32_1 = arith.constant 0 : i32
    %c0_i32_2 = arith.constant 0 : i32
    return %c0_i32, %c0_i32_0, %c0_i32_1 : i32, i32, i32
  }
  func.func @transform_3(%arg0: i32, %arg1: memref<2xi32, #tpu.memory_space<smem>>) -> (i32, i32, i32) {
    %c0_i32 = arith.constant 0 : i32
    %c0_i32_0 = arith.constant 0 : i32
    %c0_i32_1 = arith.constant 0 : i32
    %c0_i32_2 = arith.constant 0 : i32
    return %c0_i32, %c0_i32_0, %c0_i32_1 : i32, i32, i32
  }
  func.func @transform_4(%arg0: i32, %arg1: memref<2xi32, #tpu.memory_space<smem>>) -> (i32, i32, i32) {
    %c0_i32 = arith.constant 0 : i32
    %c0_i32_0 = arith.constant 0 : i32
    %c0_i32_1 = arith.constant 0 : i32
    %c0_i32_2 = arith.constant 0 : i32
    return %c0_i32, %c0_i32_0, %c0_i32_1 : i32, i32, i32
  }
  func.func @transform_5(%arg0: i32, %arg1: memref<2xi32, #tpu.memory_space<smem>>) -> (i32, i32) {
    %c0_i32 = arith.constant 0 : i32
    %c0_i32_0 = arith.constant 0 : i32
    %c0_i32_1 = arith.constant 0 : i32
    return %c0_i32, %c0_i32_0 : i32, i32
  }
  func.func @transform_6(%arg0: i32, %arg1: memref<2xi32, #tpu.memory_space<smem>>) -> (i32, i32) {
    %c0_i32 = arith.constant 0 : i32
    %c0_i32_0 = arith.constant 0 : i32
    %c0_i32_1 = arith.constant 0 : i32
    return %c0_i32, %c0_i32_0 : i32, i32
  }
  func.func @transform_7(%arg0: i32, %arg1: memref<2xi32, #tpu.memory_space<smem>>) -> (i32, i32) {
    %c0_i32 = arith.constant 0 : i32
    %c0_i32_0 = arith.constant 0 : i32
    return %arg0, %c0_i32 : i32, i32
  }
}

</mosaic_0001>

<bundles_post_ra>
// kernel: tpu_custom_call.1
= control target key start
LH: loop header
LB: loop body
LE: loop exit
PB: predicated region body
PF: predicated region fallthrough
CT: control target
= control target key end

     0   :  { %s846_s30 = smov [#allocation3]   ;;  %s1212_s0 = inlined_call_operand.vmem [shape: s32[2], index: 0, kind: input, shape index: {}]   ;;  %s1213_s1 = inlined_call_operand.vmem [shape: f32[2,8,128], index: 1, kind: input, shape index: {}]   ;;  %s1214_s2 = inlined_call_operand.vmem [shape: f32[4,32,24], index: 2, kind: input, shape index: {}]   ;;  %s1215_s3 = inlined_call_operand.vmem [shape: f32[4,32,1], index: 3, kind: input, shape index: {}]   ;;  %s1216_s4 = inlined_call_operand.vmem [shape: f32[4,32,1], index: 4, kind: input, shape index: {}]   ;;  %s1217_s5 = inlined_call_operand.vmem [shape: f32[4,32,1], index: 5, kind: input, shape index: {}]   ;;  %s1218_s6 = inlined_call_operand.vmem [shape: f32[32,96], index: 6, kind: input, shape index: {}]   ;;  %s1219_s7 = inlined_call_operand.vmem [shape: f32[32,1], index: 7, kind: input, shape index: {}]   ;;  %s1220_s8 = inlined_call_operand.hbm [shape: f32[2,32], index: 8, kind: output, shape index: {}]  }
   0x1   :  { %s14_s29 = sshll.u32 %s1212_s0, 4  ;;  %s15_s29 = int_to_ptr.vmem [resolvable:$true] %s14_s29 }
   0x2   :  { %17 = dma.vmem_to_smem %s15_s29, 16, %s846_s30, [#allocation2] }
   0x3   :  { %842 = dma.done.wait [#allocation2], 16 }
   0x4   :  { %843 = vsyncadd [#allocation2], 4294967280 }
   0x5   :  { %20 = sfence }
   0x6   :  { %v903_v0 = vld [vmem:[%s1213_s1 + $0x8] sm:$0xff]  ;;  %v908_v1 = vld [vmem:[%s1213_s1] sm:$0xff]  ;;  %s847_s13 = smov 127   ;;  %s700_s0 = sld [smem:[#allocation3 + $0x1]] }
   0x7   :  { %469 = vrot.lane.b32.xlu0 %v903_v0, %s847_s13  ;;  %155 = vrot.lane.b32.xlu1 %v908_v1, %s847_s13 }
   0x8   :  { %21 = vsyncpa [#allocation5], 0  ;;  %v848_v2 = vmov 0   ;;  %s849_s17 = smov 1   ;;  %s49_s24 = sld [smem:[#allocation3]]  ;;  %v37_v27 = vlaneseq  ;;  %vm158_vm4 = vcmask 195584  }
   0x9   :  { %771 = vset.pattern.permute.xlu1 %v848_v2  ;;  %770 = vset.pattern.permute.xlu0 %v848_v2  ;;  %vm264_vm13 = vcmask 785408  }
   0xa   :  { %769 = vset.pattern.permute.xlu2 %v848_v2  ;;  %v964_v28 = vand.u32 127, %v37_v27 }
   0xc   :  { %s914_s14 = sshll.u32 %s700_s0, 5  ;;  %vm40_vm0 = vcmp.eq.s32.totalorder %v964_v28, 127  ;;  %vm39_vm2 = vcmp.eq.s32.totalorder %v964_v28, 0 }
   0xd   :  { %s920_s1 = scalar_lea.vmem %s1216_s4, %s914_s14  ;;  %s931_s20 = scalar_lea.vmem %s1217_s5, %s914_s14  ;;  %vm969_vm1 = vmneg %vm40_vm0 }
   0xe   :  { %v379_v3 = vld [vmem:[%s920_s1 + $0x18] sm:$0xff]  ;;  %s937_s23 = scalar_lea.vmem %s1215_s3, %s914_s14  ;;  %v378_v5 = vld [vmem:[%s920_s1 + $0x10] sm:$0xff]  ;;  %v377_v7 = vld [vmem:[%s920_s1 + $0x8] sm:$0xff]  ;;  %s944_s25 = sshll.u32 %s49_s24, 5 }
   0xf   :  { %466 = vrot.lane.b32.xlu0 %v903_v0, %s849_s17  ;;  %152 = vrot.lane.b32.xlu1 %v908_v1, %s849_s17  ;;  %v432_v4 = vld [vmem:[%s931_s20 + $0x18] sm:$0xff]  ;;  %v372_v8 = vld [vmem:[%s937_s23 + $0x8] sm:$0xff]  ;;  %s57_s28 = scalar_lea.vmem %s1216_s4, %s944_s25  ;;  %s52_s9 = scalar_lea.vmem %s1215_s3, %s944_s25  ;;  %vm990_vm3 = vmneg %vm39_vm2 }
  0x10   :  { %397 = vperm.xlu2 %769, %v379_v3   ;;  %v374_v6 = vld [vmem:[%s937_s23 + $0x18] sm:$0xff]  ;;  %v373_v9 = vld [vmem:[%s937_s23 + $0x10] sm:$0xff]  ;;  %v430_v11 = vld [vmem:[%s931_s20 + $0x8] sm:$0xff]  ;;  %s112_s11 = scalar_lea.vmem %s1217_s5, %s944_s25  ;;  %s147_s12 = scalar_lea.vmem %s1214_s2, %s944_s25 }
  0x11   :  { %v61_v10 = vld [vmem:[%s57_s28 + $0x18] sm:$0xff]  ;;  %v431_v12 = vld [vmem:[%s931_s20 + $0x10] sm:$0xff]  ;;  %v376_v15 = vld [vmem:[%s920_s1] sm:$0xff]  ;;  %s461_s16 = scalar_lea.vmem %s1214_s2, %s914_s14 }
  0x12   :  { %v56_v13 = vld [vmem:[%s52_s9 + $0x18] sm:$0xff]  ;;  %v60_v14 = vld [vmem:[%s57_s28 + $0x10] sm:$0xff]  ;;  %v371_v18 = vld [vmem:[%s937_s23] sm:$0xff] }
  0x13   :  { %v116_v16 = vld [vmem:[%s112_s11 + $0x18] sm:$0xff]  ;;  %v55_v17 = vld [vmem:[%s52_s9 + $0x10] sm:$0xff]  ;;  %v59_v19 = vld [vmem:[%s57_s28 + $0x8] sm:$0xff] }
  0x14   :  { %v54_v20 = vld [vmem:[%s52_s9 + $0x8] sm:$0xff]  ;;  %v429_v21 = vld [vmem:[%s931_s20] sm:$0xff]  ;;  %v115_v25 = vld [vmem:[%s112_s11 + $0x10] sm:$0xff] }
  0x15   :  { %v58_v22 = vld [vmem:[%s57_s28] sm:$0xff]  ;;  %v114_v26 = vld [vmem:[%s112_s11 + $0x8] sm:$0xff]  ;;  %v150_v39 = vld [vmem:[%s147_s12 + $0x10] sm:$0xff] }
  0x16   :  { %v53_v23 = vld [vmem:[%s52_s9] sm:$0xff]  ;;  %v149_v37 = vld [vmem:[%s147_s12 + $0x8] sm:$0xff]  ;;  %v464_v40 = vld [vmem:[%s461_s16 + $0x10] sm:$0xff]  ;;  %s638_s9 = sshll.u32 %s1220_s8, 4  ;;  %s639_s9 = int_to_ptr.hbm [resolvable:$true] %s638_s9 }
  0x17   :  { %450 = vperm.xlu1 %771, %v432_v4   ;;  %392 = vperm.xlu0 %770, %v378_v5   ;;  %v113_v24 = vld [vmem:[%s112_s11] sm:$0xff]  ;;  %v463_v38 = vld [vmem:[%s461_s16 + $0x8] sm:$0xff]  ;;  %v151_v41 = vld [vmem:[%s147_s12 + $0x18] sm:$0xff] }
  0x18   :  { %421 = vperm.xlu2 %769, %v374_v6   ;;  %v148_v33 = vld [vmem:[%s147_s12] sm:$0xff]  ;;  %v465_v42 = vld [vmem:[%s461_s16 + $0x18] sm:$0xff] }
  0x19   :  { %v462_v34 = vld [vmem:[%s461_s16] sm:$0xff] }
  0x1f   :  { %387 = vperm.xlu1 %771, %v377_v7   ;;  %411 = vperm.xlu0 %770, %v372_v8  }
  0x20   :  { %416 = vperm.xlu2 %769, %v373_v9  }
  0x27   :  { %81 = vperm.xlu1 %771, %v61_v10   ;;  %440 = vperm.xlu0 %770, %v430_v11  }
  0x28   :  { %445 = vperm.xlu2 %769, %v431_v12  }
  0x2f   :  { %105 = vperm.xlu1 %771, %v56_v13   ;;  %76 = vperm.xlu0 %770, %v60_v14  }
  0x30   :  { %382 = vperm.xlu2 %769, %v376_v15  }
  0x37   :  { %136 = vperm.xlu1 %771, %v116_v16   ;;  %100 = vperm.xlu0 %770, %v55_v17  }
  0x38   :  { %406 = vperm.xlu2 %769, %v371_v18  }
  0x3f   :  { %71 = vperm.xlu1 %771, %v59_v19   ;;  %95 = vperm.xlu0 %770, %v54_v20  }
  0x40   :  { %435 = vperm.xlu2 %769, %v429_v21  }
  0x47   :  { %66 = vperm.xlu1 %771, %v58_v22   ;;  %90 = vperm.xlu0 %770, %v53_v23  }
  0x48   :  { %131 = vperm.xlu2 %769, %v115_v25  }
  0x4f   :  { %121 = vperm.xlu1 %771, %v113_v24  }
  0x50   :  { %126 = vperm.xlu2 %769, %v114_v26  }
  0x6a   :  { %v1006_v43 = vpop.permute.xlu2 %397 }
  0x72   :  { %v1010_v45 = vpop.permute.xlu2 %421 }
  0x79   :  { %v470_v30 = vpop.permute.xlu0 %469  ;;  %v156_v31 = vpop.permute.xlu1 %155 }
  0x7a   :  { %704 = vmatpush.msk.msra.mxu2 %vm969_vm1, %v470_v30  ;;  %665 = vmatpush.msk.msra.mxu0 %vm969_vm1, %v156_v31  ;;  %v417_v48 = vpop.permute.xlu2 %416 }
  0x7c   :  { %185 = vmatpush.msra.mxu0 %v908_v1  ;;  %498 = vmatpush.msra.mxu2 %v903_v0 }
  0x81   :  { %v467_v35 = vpop.permute.xlu0 %466  ;;  %v153_v36 = vpop.permute.xlu1 %152 }
  0x82   :  { %667 = vmatpush.msk.msra.mxu0 %vm990_vm3, %v153_v36  ;;  %706 = vmatpush.msk.msra.mxu2 %vm990_vm3, %v467_v35  ;;  %v446_v51 = vpop.permute.xlu2 %445 }
  0x83   :  { %668 = vmatmul.msk.f32.vlgmr.msra.gmra.mxu0 %vm158_vm4, %v148_v33  ;;  %707 = vmatmul.msk.f32.vlgmr.msra.gmra.mxu2 %vm158_vm4, %v462_v34  ;;  %v455_v33 = vsel %vm40_vm0, %v446_v51, 0.0 }
  0x89   :  { %v1008_v44 = vpop.permute.xlu1 %450  ;;  %v393_v46 = vpop.permute.xlu0 %392 }
  0x8a   :  { %v383_v54 = vpop.permute.xlu2 %382  ;;  %v402_v16 = vsel %vm39_vm2, %v393_v46, 0.0 }
  0x8b   :  { %669 = vmatmul.msk.f32.gmra.mxu0 %vm158_vm4, %v149_v37  ;;  %708 = vmatmul.msk.f32.gmra.mxu2 %vm158_vm4, %v463_v38  ;;  %v400_v60 = vsel %vm39_vm2, %v383_v54, 0.0  ;;  %v426_v26 = vadd.f32 %v417_v48, %v402_v16 }
  0x91   :  { %v388_v47 = vpop.permute.xlu1 %387  ;;  %v412_v49 = vpop.permute.xlu0 %411 }
  0x92   :  { %v407_v57 = vpop.permute.xlu2 %406  ;;  %v401_v4 = vsel %vm39_vm2, %v388_v47, 0.0 }
  0x93   :  { %670 = vmatmul.msk.f32.gmra.mxu0 %vm158_vm4, %v150_v39  ;;  %709 = vmatmul.msk.f32.gmra.mxu2 %vm158_vm4, %v464_v40  ;;  %v424_v62 = vadd.f32 %v407_v57, %v400_v60  ;;  %v425_v9 = vadd.f32 %v412_v49, %v401_v4  ;;  %v459_v40 = vadd.f32 %v455_v33, %v426_v26  ;;  %v456_v57 = vsel %vm40_vm0, %v1008_v44, 0.0 }
  0x99   :  { %v82_v50 = vpop.permute.xlu1 %81  ;;  %v441_v52 = vpop.permute.xlu0 %440 }
  0x9a   :  { %v436_v63 = vpop.permute.xlu2 %435  ;;  %v454_v11 = vsel %vm40_vm0, %v441_v52, 0.0  ;;  %v87_v20 = vsel %vm39_vm2, %v82_v50, 0.0 }
  0x9b   :  { %671 = vmatmul.msk.f32.gmra.mxu0 %vm158_vm4, %v151_v41  ;;  %710 = vmatmul.msk.f32.gmra.mxu2 %vm158_vm4, %v465_v42  ;;  %v453_v0 = vsel %vm40_vm0, %v436_v63, 0.0  ;;  %v458_v15 = vadd.f32 %v454_v11, %v425_v9  ;;  %v403_v42 = vsel %vm39_vm2, %v1006_v43, 0.0 }
  0x9c   :  { %v457_v2 = vadd.f32 %v453_v0, %v424_v62 }
  0xa1   :  { %v106_v53 = vpop.permute.xlu1 %105  ;;  %v77_v55 = vpop.permute.xlu0 %76 }
  0xa2   :  { %v86_v7 = vsel %vm39_vm2, %v77_v55, 0.0  ;;  %v132_v13 = vpop.permute.xlu2 %131  ;;  %v111_v34 = vadd.f32 %v106_v53, %v87_v20  ;;  %v427_v53 = vadd.f32 %v1010_v45, %v403_v42  ;;  %v42_v42 = vld [vmem:[%s1218_s6 + $0x8] sm:$0xff] }
  0xa3   :  { %v141_v14 = vsel %vm40_vm0, %v132_v13, 0.0 }
  0xa4   :  { %v460_v45 = vadd.f32 %v456_v57, %v427_v53 }
  0xa9   :  { %v137_v56 = vpop.permute.xlu1 %136  ;;  %v101_v58 = vpop.permute.xlu0 %100 }
  0xaa   :  { %v110_v12 = vadd.f32 %v101_v58, %v86_v7  ;;  %v142_v37 = vsel %vm40_vm0, %v137_v56, 0.0  ;;  %v127_v54 = vpop.permute.xlu2 %126 }
  0xab   :  { %v146_v46 = vadd.f32 %v142_v37, %v111_v34 }
  0xac   :  { %v145_v21 = vadd.f32 %v141_v14, %v110_v12 }
  0xb1   :  { %v72_v59 = vpop.permute.xlu1 %71  ;;  %v96_v1 = vpop.permute.xlu0 %95 }
  0xb2   :  { %v85_v48 = vsel %vm39_vm2, %v72_v59, 0.0 }
  0xb3   :  { %v109_v43 = vadd.f32 %v96_v1, %v85_v48 }
  0xb9   :  { %v67_v3 = vpop.permute.xlu1 %66  ;;  %v91_v18 = vpop.permute.xlu0 %90 }
  0xba   :  { %v84_v17 = vsel %vm39_vm2, %v67_v3, 0.0 }
  0xbb   :  { %v108_v27 = vadd.f32 %v91_v18, %v84_v17 }
  0xc1   :  { %v122_v22 = vpop.permute.xlu1 %121 }
  0xc2   :  { %v139_v35 = vsel %vm40_vm0, %v122_v22, 0.0  ;;  %v46_v22 = vld [vmem:[%s1219_s7 + $0x8] sm:$0xff] }
  0xc3   :  { %v143_v41 = vadd.f32 %v139_v35, %v108_v27 }
 0x100   :  { %v188_v61 = vpop.f32.mrf.mxu0 }
 0x101   :  { %v189_v49 = vadd.f32 %v188_v61, %v143_v41  ;;  %v140_v61 = vsel %vm40_vm0, %v127_v54, 0.0 }
 0x103   :  { %v204_v60 = vmul.f32 1.442695, %v189_v49  ;;  %vm200_vm10 = vcmp.gt.f32.partialorder %v189_v49, 0.0 }
 0x106   :  { %v501_v5 = vpop.f32.mrf.mxu2 }
 0x107   :  { %v502_v6 = vadd.f32 %v501_v5, %v457_v2  ;;  %v144_v2 = vadd.f32 %v140_v61, %v109_v43 }
 0x108   :  { %v1020_v8 = vpop.f32.mrf.mxu0 }
 0x109   :  { %v517_v10 = vmul.f32 1.442695, %v502_v6  ;;  %vm513_vm5 = vcmp.gt.f32.partialorder %v502_v6, 0.0  ;;  %v192_v4 = vadd.f32 %v1020_v8, %v144_v2 }
 0x10b   :  { %772 = vpow2.f32 %v517_v10  ;;  %v206_v13 = vmul.f32 1.442695, %v192_v4  ;;  %vm201_vm12 = vcmp.gt.f32.partialorder %v192_v4, 0.0 }
 0x10e   :  { %v504_v19 = vpop.f32.mrf.mxu2 }
 0x10f   :  { %v505_v23 = vadd.f32 %v504_v19, %v458_v15 }
 0x110   :  { %v194_v24 = vpop.f32.mrf.mxu0 }
 0x111   :  { %v773_v25 = vpop.eup %772  ;;  %v519_v30 = vmul.f32 1.442695, %v505_v23  ;;  %v195_v31 = vadd.f32 %v194_v24, %v145_v21  ;;  %vm514_vm6 = vcmp.gt.f32.partialorder %v505_v23, 0.0  ;;  %v48_v24 = vld [vmem:[%s1219_s7 + $0x18] sm:$0xff] }
 0x112   :  { %v711_v36 = vadd.f32 -1.0, %v773_v25  ;;  %v47_v25 = vld [vmem:[%s1219_s7 + $0x10] sm:$0xff] }
 0x113   :  { %774 = vpow2.f32 %v519_v30  ;;  %v208_v38 = vmul.f32 1.442695, %v195_v31  ;;  %vm202_vm7 = vcmp.gt.f32.partialorder %v195_v31, 0.0 }
 0x114   :  { %v1038_v39 = vsel %vm513_vm5, %v502_v6, %v711_v36 }
 0x115   :  { %545 = vrot.lane.b32.xlu0 %v1038_v39, %s847_s13  ;;  %776 = vpow2.f32 %v208_v38 }
 0x116   :  { %v507_v47 = vpop.f32.mrf.mxu2 }
 0x117   :  { %v508_v50 = vadd.f32 %v507_v47, %v459_v40 }
 0x118   :  { %v197_v51 = vpop.f32.mrf.mxu0 }
 0x119   :  { %v775_v52 = vpop.eup %774  ;;  %v521_v55 = vmul.f32 1.442695, %v508_v50  ;;  %v198_v56 = vadd.f32 %v197_v51, %v146_v46  ;;  %vm515_vm8 = vcmp.gt.f32.partialorder %v508_v50, 0.0 }
 0x11a   :  { %v712_v58 = vadd.f32 -1.0, %v775_v52 }
 0x11b   :  { %778 = vpow2.f32 %v521_v55  ;;  %v210_v59 = vmul.f32 1.442695, %v198_v56  ;;  %v777_v63 = vpop.eup %776  ;;  %vm203_vm9 = vcmp.gt.f32.partialorder %v198_v56, 0.0 }
 0x11c   :  { %v1053_v62 = vsel %vm514_vm6, %v505_v23, %v712_v58  ;;  %v674_v1 = vadd.f32 -1.0, %v777_v63  ;;  %v45_v23 = vld [vmem:[%s1219_s7] sm:$0xff] }
 0x11d   :  { %780 = vpow2.f32 %v210_v59  ;;  %547 = vrot.lane.b32.xlu1 %v1053_v62, %s847_s13 }
 0x11e   :  { %v510_v0 = vpop.f32.mrf.mxu2  ;;  %782 = vpow2.f32 %v204_v60  ;;  %v1060_v11 = vsel %vm202_vm7, %v195_v31, %v674_v1  ;;  %vm352_vm7 = vcmask 130112  }
 0x11f   :  { %v511_v44 = vadd.f32 %v510_v0, %v460_v45 }
 0x121   :  { %v779_v3 = vpop.eup %778  ;;  %v523_v5 = vmul.f32 1.442695, %v511_v44  ;;  %vm516_vm11 = vcmp.gt.f32.partialorder %v511_v44, 0.0 }
 0x122   :  { %v713_v6 = vadd.f32 -1.0, %v779_v3 }
 0x123   :  { %v781_v7 = vpop.eup %780  ;;  %784 = vpow2.f32 %v523_v5 }
 0x124   :  { %v675_v9 = vadd.f32 -1.0, %v781_v7  ;;  %v1058_v10 = vsel %vm515_vm8, %v508_v50, %v713_v6  ;;  %v783_v12 = vpop.eup %782  ;;  %786 = vpow2.f32 %v206_v13  ;;  %v44_v50 = vld [vmem:[%s1218_s6 + $0x18] sm:$0xff]  ;;  %vm356_vm8 = vcmask 195712  }
 0x125   :  { %549 = vrot.lane.b32.xlu0 %v1058_v10, %s847_s13  ;;  %236 = vrot.lane.b32.xlu1 %v1060_v11, %s847_s13  ;;  %v672_v14 = vadd.f32 -1.0, %v783_v12 }
 0x126   :  { %v1066_v8 = vsel %vm203_vm9, %v198_v56, %v675_v9  ;;  %vm360_vm9 = vcmask 261312  }
 0x127   :  { %238 = vrot.lane.b32.xlu2 %v1066_v8, %s847_s13  ;;  %v1070_v18 = vsel %vm200_vm10, %v189_v49, %v672_v14  ;;  %v43_v49 = vld [vmem:[%s1218_s6 + $0x10] sm:$0xff]  ;;  %vm363_vm10 = vcmask 253952  }
 0x129   :  { %v785_v15 = vpop.eup %784 }
 0x12a   :  { %v714_v16 = vadd.f32 -1.0, %v785_v15  ;;  %v787_v19 = vpop.eup %786 }
 0x12b   :  { %v673_v20 = vadd.f32 -1.0, %v787_v19 }
 0x12c   :  { %v532_v17 = vsel %vm516_vm11, %v511_v44, %v714_v16 }
 0x12d   :  { %539 = vrot.lane.b32.xlu1 %v532_v17, %s849_s17  ;;  %232 = vrot.lane.b32.xlu0 %v1070_v18, %s847_s13  ;;  %v217_v21 = vsel %vm201_vm12, %v192_v4, %v673_v20 }
 0x12f   :  { %551 = vrot.lane.b32.xlu2 %v532_v17, %s847_s13 }
 0x135   :  { %226 = vrot.lane.b32.xlu1 %v1066_v8, %s849_s17  ;;  %535 = vrot.lane.b32.xlu0 %v1053_v62, %s849_s17 }
 0x137   :  { %234 = vrot.lane.b32.xlu2 %v217_v21, %s847_s13 }
 0x13d   :  { %222 = vrot.lane.b32.xlu1 %v217_v21, %s849_s17  ;;  %224 = vrot.lane.b32.xlu0 %v1060_v11, %s849_s17 }
 0x13f   :  { %537 = vrot.lane.b32.xlu2 %v1058_v10, %s849_s17 }
 0x145   :  { %251 = vperm.xlu1 %771, %v46_v22   ;;  %246 = vperm.xlu0 %770, %v45_v23  }
 0x147   :  { %533 = vrot.lane.b32.xlu2 %v1038_v39, %s849_s17 }
 0x14d   :  { %261 = vperm.xlu0 %770, %v48_v24  }
 0x14f   :  { %220 = vrot.lane.b32.xlu2 %v1070_v18, %s849_s17 }
 0x157   :  { %256 = vperm.xlu2 %769, %v47_v25  }
 0x181   :  { %v239_v26 = vpop.permute.xlu2 %238 }
 0x182   :  { %677 = vmatpush.msk.msrb.mxu0 %vm969_vm1, %v239_v26  ;;  %739 = vmatpush.msk.msra.mxu1 %vm969_vm1, %v239_v26 }
 0x187   :  { %v546_v30 = vpop.permute.xlu0 %545 }
 0x189   :  { %v552_v27 = vpop.permute.xlu2 %551 }
 0x18a   :  { %716 = vmatpush.msk.msrb.mxu2 %vm969_vm1, %v552_v27  ;;  %751 = vmatpush.msk.msra.mxu3 %vm969_vm1, %v552_v27 }
 0x18f   :  { %v548_v31 = vpop.permute.xlu1 %547 }
 0x191   :  { %v235_v33 = vpop.permute.xlu2 %234 }
 0x197   :  { %v550_v34 = vpop.permute.xlu0 %549  ;;  %v237_v35 = vpop.permute.xlu1 %236 }
 0x198   :  { %679 = vmatpush.msk.msrb.mxu0 %vm969_vm1, %v237_v35  ;;  %740 = vmatpush.msk.msra.mxu1 %vm969_vm1, %v237_v35 }
 0x199   :  { %718 = vmatpush.msk.msrb.mxu2 %vm969_vm1, %v550_v34  ;;  %752 = vmatpush.msk.msra.mxu3 %vm969_vm1, %v550_v34  ;;  %v538_v36 = vpop.permute.xlu2 %537 }
 0x19a   :  { %681 = vmatpush.msk.msrb.mxu0 %vm969_vm1, %v235_v33  ;;  %741 = vmatpush.msk.msra.mxu1 %vm969_vm1, %v235_v33 }
 0x19b   :  { %720 = vmatpush.msk.msrb.mxu2 %vm969_vm1, %v548_v31  ;;  %753 = vmatpush.msk.msra.mxu3 %vm969_vm1, %v548_v31 }
 0x19d   :  { %722 = vmatpush.msk.msrb.mxu2 %vm969_vm1, %v546_v30  ;;  %754 = vmatpush.msk.msra.mxu3 %vm969_vm1, %v546_v30 }
 0x19f   :  { %565 = vmatpush.msrb.mxu2 %v532_v17  ;;  %755 = vmatpush.msra.mxu3 %v532_v17  ;;  %v540_v37 = vpop.permute.xlu1 %539  ;;  %v233_v38 = vpop.permute.xlu0 %232 }
 0x1a0   :  { %683 = vmatpush.msk.msrb.mxu0 %vm969_vm1, %v233_v38  ;;  %742 = vmatpush.msk.msra.mxu1 %vm969_vm1, %v233_v38  ;;  %v850_v38 = vmov 128.0  }
 0x1a1   :  { %566 = vmatpush.msrb.mxu2 %v1058_v10  ;;  %756 = vmatpush.msra.mxu3 %v1058_v10  ;;  %v534_v41 = vpop.permute.xlu2 %533 }
 0x1a2   :  { %285 = vmatpush.msrb.mxu0 %v1066_v8  ;;  %743 = vmatpush.msra.mxu1 %v1066_v8 }
 0x1a3   :  { %567 = vmatpush.msrb.mxu2 %v1053_v62  ;;  %757 = vmatpush.msra.mxu3 %v1053_v62 }
 0x1a4   :  { %286 = vmatpush.msrb.mxu0 %v1060_v11  ;;  %744 = vmatpush.msra.mxu1 %v1060_v11 }
 0x1a5   :  { %568 = vmatpush.msrb.mxu2 %v1038_v39  ;;  %758 = vmatpush.msra.mxu3 %v1038_v39  ;;  %v41_v39 = vld [vmem:[%s1218_s6] sm:$0xff]  ;;  %s851_s6 = smov [#allocation4]  }
 0x1a6   :  { %287 = vmatpush.msrb.mxu0 %v217_v21  ;;  %745 = vmatpush.msra.mxu1 %v217_v21  ;;  %s636_s28 = sshll.u32 %s851_s6, 4  ;;  %s637_s28 = int_to_ptr.vmem [resolvable:$true] %s636_s28 }
 0x1a7   :  { %724 = vmatpush.msk.msrb.mxu2 %vm990_vm3, %v540_v37  ;;  %759 = vmatpush.msk.msra.mxu3 %vm990_vm3, %v540_v37  ;;  %v227_v29 = vpop.permute.xlu1 %226  ;;  %v536_v40 = vpop.permute.xlu0 %535 }
 0x1a8   :  { %288 = vmatpush.msrb.mxu0 %v1070_v18  ;;  %746 = vmatpush.msra.mxu1 %v1070_v18 }
 0x1a9   :  { %726 = vmatpush.msk.msrb.mxu2 %vm990_vm3, %v538_v36  ;;  %760 = vmatpush.msk.msra.mxu3 %vm990_vm3, %v538_v36  ;;  %v221_v48 = vpop.permute.xlu2 %220 }
 0x1aa   :  { %685 = vmatpush.msk.msrb.mxu0 %vm990_vm3, %v227_v29  ;;  %747 = vmatpush.msk.msra.mxu1 %vm990_vm3, %v227_v29 }
 0x1ab   :  { %728 = vmatpush.msk.msrb.mxu2 %vm990_vm3, %v536_v40  ;;  %761 = vmatpush.msk.msra.mxu3 %vm990_vm3, %v536_v40 }
 0x1ad   :  { %730 = vmatpush.msk.msrb.mxu2 %vm990_vm3, %v534_v41  ;;  %762 = vmatpush.msk.msra.mxu3 %vm990_vm3, %v534_v41 }
 0x1ae   :  { %731 = vmatmul.msk.f32.vlgmr.msrb.gmra.mxu2 %vm264_vm13, %v41_v39  ;;  %732 = vmatmul.msk.f32.vlgmr.msra.gmra.mxu3 %vm264_vm13, %v42_v42 }
 0x1af   :  { %v225_v46 = vpop.permute.xlu0 %224  ;;  %v223_v47 = vpop.permute.xlu1 %222 }
 0x1b0   :  { %687 = vmatpush.msk.msrb.mxu0 %vm990_vm3, %v225_v46  ;;  %748 = vmatpush.msk.msra.mxu1 %vm990_vm3, %v225_v46 }
 0x1b1   :  { %v257_v45 = vpop.permute.xlu2 %256 }
 0x1b2   :  { %689 = vmatpush.msk.msrb.mxu0 %vm990_vm3, %v223_v47  ;;  %749 = vmatpush.msk.msra.mxu1 %vm990_vm3, %v223_v47 }
 0x1b4   :  { %691 = vmatpush.msk.msrb.mxu0 %vm990_vm3, %v221_v48  ;;  %750 = vmatpush.msk.msra.mxu1 %vm990_vm3, %v221_v48 }
 0x1b5   :  { %692 = vmatmul.msk.f32.vlgmr.msrb.gmra.mxu0 %vm264_vm13, %v41_v39  ;;  %693 = vmatmul.msk.f32.vlgmr.msra.gmra.mxu1 %vm264_vm13, %v42_v42 }
 0x1b6   :  { %733 = vmatmul.msk.f32.gmra.mxu3 %vm264_vm13, %v43_v49 }
 0x1b7   :  { %v252_v51 = vpop.permute.xlu1 %251  ;;  %v247_v52 = vpop.permute.xlu0 %246 }
 0x1bd   :  { %694 = vmatmul.msk.f32.gmra.mxu1 %vm264_vm13, %v43_v49 }
 0x1be   :  { %734 = vmatmul.msk.f32.gmra.mxu3 %vm264_vm13, %v44_v50 }
 0x1bf   :  { %v262_v11 = vpop.permute.xlu0 %261 }
 0x1c5   :  { %695 = vmatmul.msk.f32.gmra.mxu1 %vm264_vm13, %v44_v50 }
 0x231   :  { %v574_v32 = vpop.f32.mrf.mxu2  ;;  %v577_v53 = vpop.f32.mrf.mxu3 }
 0x232   :  { %v575_v54 = vadd.f32 %v574_v32, %v247_v52  ;;  %v294_v55 = vpop.f32.mrf.mxu0  ;;  %v297_v56 = vpop.f32.mrf.mxu1  ;;  %v578_v60 = vadd.f32 %v577_v53, %v252_v51 }
 0x233   :  { %v295_v57 = vadd.f32 %v294_v55, %v247_v52  ;;  %v298_v43 = vadd.f32 %v297_v56, %v252_v51  ;;  %v350_v52 = vadd.s32 4294967288, %v964_v28 }
 0x234   :  { %v590_v58 = vmul.f32 1.442695, %v575_v54  ;;  %v592_v62 = vmul.f32 1.442695, %v578_v60  ;;  %vm586_vm14 = vcmp.gt.f32.partialorder %v575_v54, 0.0  ;;  %vm587_vm2 = vcmp.gt.f32.partialorder %v578_v60, 0.0 }
 0x235   :  { %v310_v59 = vmul.f32 1.442695, %v295_v57  ;;  %v312_v61 = vmul.f32 1.442695, %v298_v43  ;;  %vm306_vm15 = vcmp.gt.f32.partialorder %v295_v57, 0.0  ;;  %vm307_vm0 = vcmp.gt.f32.partialorder %v298_v43, 0.0 }
 0x236   :  { %788 = vpow2.f32 %v590_v58  ;;  %v358_v58 = vadd.s32 4294967272, %v964_v28 }
 0x237   :  { %790 = vpow2.f32 %v310_v59 }
 0x238   :  { %792 = vpow2.f32 %v312_v61 }
 0x239   :  { %v580_v63 = vpop.f32.mrf.mxu3  ;;  %794 = vpow2.f32 %v592_v62 }
 0x23a   :  { %v300_v0 = vpop.f32.mrf.mxu1  ;;  %v581_v1 = vadd.f32 %v580_v63, %v257_v45 }
 0x23b   :  { %v301_v2 = vadd.f32 %v300_v0, %v257_v45 }
 0x23c   :  { %v789_v44 = vpop.eup %788  ;;  %v594_v12 = vmul.f32 1.442695, %v581_v1  ;;  %vm588_vm5 = vcmp.gt.f32.partialorder %v581_v1, 0.0 }
 0x23d   :  { %v314_v3 = vmul.f32 1.442695, %v301_v2  ;;  %v735_v4 = vadd.f32 -1.0, %v789_v44  ;;  %v791_v5 = vpop.eup %790  ;;  %vm308_vm1 = vcmp.gt.f32.partialorder %v301_v2, 0.0 }
 0x23e   :  { %v793_v6 = vpop.eup %792  ;;  %v696_v9 = vadd.f32 -1.0, %v791_v5 }
 0x23f   :  { %796 = vpow2.f32 %v314_v3  ;;  %v602_v7 = vsel %vm586_vm14, %v575_v54, %v735_v4  ;;  %v697_v10 = vadd.f32 -1.0, %v793_v6  ;;  %v795_v17 = vpop.eup %794  ;;  %v354_v54 = vadd.s32 4294967280, %v964_v28 }
 0x240   :  { %606 = vadd.xlane.f32.xlu0 %v602_v7  ;;  %v322_v8 = vsel %vm306_vm15, %v295_v57, %v696_v9  ;;  %798 = vpow2.f32 %v594_v12  ;;  %v736_v22 = vadd.f32 -1.0, %v795_v17 }
 0x241   :  { %v583_v13 = vpop.f32.mrf.mxu3  ;;  %v323_v15 = vsel %vm307_vm0, %v298_v43, %v697_v10  ;;  %326 = vadd.xlane.f32.xlu1 %v322_v8 }
 0x242   :  { %v584_v14 = vadd.f32 %v583_v13, %v262_v11  ;;  %v303_v16 = vpop.f32.mrf.mxu1  ;;  %328 = vadd.xlane.f32.xlu2 %v323_v15  ;;  %v603_v25 = vsel %vm587_vm2, %v578_v60, %v736_v22 }
 0x243   :  { %v304_v18 = vadd.f32 %v303_v16, %v262_v11 }
 0x244   :  { %v596_v19 = vmul.f32 1.442695, %v584_v14  ;;  %vm589_vm4 = vcmp.gt.f32.partialorder %v584_v14, 0.0 }
 0x245   :  { %v797_v20 = vpop.eup %796  ;;  %v316_v21 = vmul.f32 1.442695, %v304_v18  ;;  %vm309_vm3 = vcmp.gt.f32.partialorder %v304_v18, 0.0 }
 0x246   :  { %800 = vpow2.f32 %v596_v19  ;;  %v698_v23 = vadd.f32 -1.0, %v797_v20  ;;  %v799_v26 = vpop.eup %798 }
 0x247   :  { %802 = vpow2.f32 %v316_v21  ;;  %v737_v33 = vadd.f32 -1.0, %v799_v26 }
 0x248   :  { %v324_v24 = vsel %vm308_vm1, %v301_v2, %v698_v23  ;;  %804 = vrcp.f32 %v850_v38 }
 0x249   :  { %330 = vadd.xlane.f32.xlu1 %v324_v24  ;;  %v604_v37 = vsel %vm588_vm5, %v581_v1, %v737_v33 }
 0x24a   :  { %608 = vadd.xlane.f32.xlu2 %v603_v25 }
 0x24c   :  { %v801_v27 = vpop.eup %800 }
 0x24d   :  { %v803_v30 = vpop.eup %802  ;;  %v738_v31 = vadd.f32 -1.0, %v801_v27 }
 0x24e   :  { %v699_v34 = vadd.f32 -1.0, %v803_v30  ;;  %v805_v29 = vpop.eup %804 }
 0x24f   :  { %v605_v36 = vsel %vm589_vm4, %v584_v14, %v738_v31  ;;  %v335_v40 = vmul.f32 128.0, %v805_v29  ;;  %vm339_vm6 = vweird.f32 %v805_v29 }
 0x250   :  { %v325_v35 = vsel %vm309_vm3, %v304_v18, %v699_v34 }
 0x251   :  { %332 = vadd.xlane.f32.xlu0 %v325_v35  ;;  %612 = vadd.xlane.f32.xlu1 %v605_v36  ;;  %v336_v41 = vsub.f32 1.0, %v335_v40 }
 0x252   :  { %610 = vadd.xlane.f32.xlu2 %v604_v37 }
 0x253   :  { %v337_v42 = vmul.f32 %v805_v29, %v336_v41 }
 0x255   :  { %v338_v47 = vadd.f32 %v805_v29, %v337_v42 }
 0x257   :  { %v340_v50 = vsel %vm339_vm6, %v805_v29, %v338_v47 }
 0x2b3   :  { %v607_v48 = vpop.xlane.xlu0 %606 }
 0x2b4   :  { %v327_v39 = vpop.xlane.xlu1 %326  ;;  %v614_v60 = vmul.f32 %v607_v48, %v340_v50 }
 0x2b5   :  { %v329_v46 = vpop.xlane.xlu2 %328  ;;  %v341_v53 = vmul.f32 %v340_v50, %v327_v39 }
 0x2b6   :  { %v342_v32 = vmul.f32 %v340_v50, %v329_v46  ;;  %v622_v4 = vperm.slane %v614_v60, %v964_v28 }
 0x2b7   :  { %v349_v43 = vperm.slane %v341_v53, %v964_v28 }
 0x2b8   :  { %v351_v57 = vperm.slane %v342_v32, %v350_v52 }
 0x2ba   :  { %v353_v44 = vsel %vm352_vm7, %v351_v57, %v349_v43 }
 0x2bc   :  { %v331_v49 = vpop.xlane.xlu1 %330 }
 0x2bd   :  { %v609_v51 = vpop.xlane.xlu2 %608  ;;  %v343_v55 = vmul.f32 %v340_v50, %v331_v49 }
 0x2be   :  { %v615_v56 = vmul.f32 %v609_v51, %v340_v50 }
 0x2bf   :  { %v355_v59 = vperm.slane %v343_v55, %v354_v54 }
 0x2c0   :  { %v623_v45 = vperm.slane %v615_v56, %v350_v52 }
 0x2c1   :  { %v357_v5 = vsel %vm356_vm8, %v355_v59, %v353_v44 }
 0x2c2   :  { %v624_v10 = vsel %vm352_vm7, %v623_v45, %v622_v4 }
 0x2c4   :  { %v333_v61 = vpop.xlane.xlu0 %332  ;;  %v613_v62 = vpop.xlane.xlu1 %612 }
 0x2c5   :  { %v344_v63 = vmul.f32 %v340_v50, %v333_v61  ;;  %v611_v0 = vpop.xlane.xlu2 %610  ;;  %v617_v2 = vmul.f32 %v613_v62, %v340_v50 }
 0x2c6   :  { %v616_v1 = vmul.f32 %v611_v0, %v340_v50 }
 0x2c7   :  { %v359_v3 = vperm.slane %v344_v63, %v358_v58  ;;  %v627_v6 = vperm.slane %v617_v2, %v358_v58 }
 0x2c8   :  { %v625_v7 = vperm.slane %v616_v1, %v354_v54 }
 0x2c9   :  { %v361_v9 = vsel %vm360_vm9, %v359_v3, %v357_v5 }
 0x2ca   :  { %364 = vst.msk [vmem:[#allocation4] sm:$0x1] %vm363_vm10, %v361_v9  ;;  %v626_v11 = vsel %vm356_vm8, %v625_v7, %v624_v10 }
 0x2cb   :  { %v628_v28 = vsel %vm360_vm9, %v627_v6, %v626_v11 }
 0x2cc   :  { %630 = vst.msk [vmem:[#allocation4 + $0x1] sm:$0x1] %vm363_vm10, %v628_v28 }
 0x2cd   :  { %641 = dma.vmem_to_hbm [thread:$0]  %s637_s28, 32, %s639_s9, [#allocation5]  }
 0x2ce   :  { %844 = dma.done.wait [#allocation5], 32  }
 0x2cf   :  { %845 = vsyncadd [#allocation5], 4294967264 }
 0x2d0   :  { %646 = vsyncpa [#allocation5], 1 }

</bundles_post_ra>
